<compile_context>
chip_gen: v6e
topology: v6e:2x2x1
jax: 0.10.0
libtpu: 0.0.40
codegen_flags: <defaults>
</compile_context>

<pallas_src>
import jax
import jax.numpy as jnp
from jax.experimental import pallas as pl
from jax.experimental.pallas import tpu as pltpu


def _normalize_kernel(scale_ref, bias_ref, img_ref, out_ref):
    # scale_ref / bias_ref: (C,) float32 in SMEM.
    # img_ref: (th, W) uint8 tile of channel c;  out_ref: (th, W) float32 tile.
    c = pl.program_id(0)
    scale = scale_ref[c]
    bias = bias_ref[c]
    out_ref[...] = img_ref[...].astype(jnp.float32) * scale + bias


def _choose_row_tile(h, w, target_elems=256 * 1024):
    # Biggest row-block (multiple of 8) whose tile stays around ~256K elements
    # (~0.25 MB u8 in + ~1 MB f32 out per buffer -> a few MiB double-buffered).
    th = (target_elems // max(w, 1)) // 8 * 8
    th = max(th, 8)
    return min(h, th)


def numpy_normalize(img_hwc, mean, std):
    """img_hwc: (H, W, C) uint8 (or numeric) array. Returns (C, H, W) float32."""
    img_hwc = jnp.asarray(img_hwc)
    H, W, C = img_hwc.shape
    assert len(mean) == C and len(std) == C

    # Fold (x/255 - mean)/std into a single per-channel affine x*scale + bias.
    scale = jnp.asarray([1.0 / (255.0 * s) for s in std], dtype=jnp.float32)
    bias = jnp.asarray([-m / s for m, s in zip(mean, std)], dtype=jnp.float32)

    # Glue: HWC -> CHW on the narrow dtype (uint8, 1 B/elem) in XLA.
    img_chw = jnp.transpose(img_hwc, (2, 0, 1))

    th = _choose_row_tile(H, W)
    grid = (C, pl.cdiv(H, th))

    out = pl.pallas_call(
        _normalize_kernel,
        out_shape=jax.ShapeDtypeStruct((C, H, W), jnp.float32),
        grid=grid,
        in_specs=[
            pl.BlockSpec(memory_space=pltpu.MemorySpace.SMEM),    # scale (C,)
            pl.BlockSpec(memory_space=pltpu.MemorySpace.SMEM),    # bias  (C,)
            pl.BlockSpec((None, th, W), lambda c, i: (c, i, 0)),  # image tile
        ],
        out_specs=pl.BlockSpec((None, th, W), lambda c, i: (c, i, 0)),
        compiler_params=pltpu.CompilerParams(
            dimension_semantics=("parallel", "parallel")
        ),
    )(scale, bias, img_chw)

    return out


if __name__ == "__main__":
    key = jax.random.PRNGKey(0)
    H, W, C = 32, 48, 3

    # Deterministic synthetic "PIL image": uint8 HWC.
    img = jax.random.randint(key, (H, W, C), 0, 256, dtype=jnp.int32).astype(jnp.uint8)

    # Deterministic per-channel mean / std (module __init__ args).
    mean = [0.485, 0.456, 0.406]
    std = [0.229, 0.224, 0.225]

    out = numpy_normalize(img, mean, std)
    out = jax.block_until_ready(out)

    # Reference in plain JAX (same math, f32).
    ref = (jnp.transpose(img.astype(jnp.float32), (2, 0, 1)) / 255.0
           - jnp.asarray(mean, jnp.float32).reshape(-1, 1, 1)) \
          / jnp.asarray(std, jnp.float32).reshape(-1, 1, 1)

    assert out.shape == (C, H, W)
    assert jnp.allclose(out, ref, atol=1e-5), "mismatch vs reference"

    print("KERNEL_OK")
</pallas_src>

<mosaic_0001>
module attributes {stable_mosaic.version = 11 : i64} {
  func.func @_normalize_kernel(%arg0: i32, %arg1: i32, %arg2: memref<3xf32, #tpu.memory_space<smem>>, %arg3: memref<3xf32, #tpu.memory_space<smem>>, %arg4: memref<1x32x48xi8, #tpu.memory_space<vmem>>, %arg5: memref<1x32x48xf32, #tpu.memory_space<vmem>>) attributes {dimension_semantics = [#tpu.dimension_semantics<parallel>, #tpu.dimension_semantics<parallel>], iteration_bounds = array<i64: 3, 1>, scalar_prefetch = 0 : i64, scratch_operands = 0 : i64, tpu.core_type = #tpu.core_type<tc>, window_params = [{transform_indices = @transform_0, window_bounds = array<i64: 3>}, {transform_indices = @transform_1, window_bounds = array<i64: 3>}, {transform_indices = @transform_2, window_bounds = array<i64: 1, 32, 48>}, {transform_indices = @transform_3, window_bounds = array<i64: 1, 32, 48>}]} {
    %0 = arith.index_cast %arg0 : i32 to index
    %1 = memref.load %arg2[%0] : memref<3xf32, #tpu.memory_space<smem>>
    %2 = arith.index_cast %arg0 : i32 to index
    %3 = memref.load %arg3[%2] : memref<3xf32, #tpu.memory_space<smem>>
    %c0 = arith.constant 0 : index
    %c0_0 = arith.constant 0 : index
    %c0_1 = arith.constant 0 : index
    %4 = vector.load %arg4[%c0, %c0_0, %c0_1] : memref<1x32x48xi8, #tpu.memory_space<vmem>>, vector<1x32x48xi8>
    %5 = vector.shape_cast %4 : vector<1x32x48xi8> to vector<32x48xi8>
    %6 = arith.uitofp %5 : vector<32x48xi8> to vector<32x48xf32>
    %7 = vector.broadcast %1 : f32 to vector<32x48xf32>
    %8 = arith.mulf %6, %7 : vector<32x48xf32>
    %9 = vector.broadcast %3 : f32 to vector<32x48xf32>
    %10 = arith.addf %8, %9 : vector<32x48xf32>
    %c0_2 = arith.constant 0 : index
    %c0_3 = arith.constant 0 : index
    %c0_4 = arith.constant 0 : index
    %11 = vector.load %arg5[%c0_2, %c0_3, %c0_4] : memref<1x32x48xf32, #tpu.memory_space<vmem>>, vector<1x32x48xf32>
    %12 = vector.shape_cast %11 : vector<1x32x48xf32> to vector<32x48xf32>
    %13 = vector.shape_cast %10 : vector<32x48xf32> to vector<1x32x48xf32>
    tpu.vector_store %arg5[%c0_2, %c0_3, %c0_4], %13 {strides = array<i32>} : memref<1x32x48xf32, #tpu.memory_space<vmem>>, vector<1x32x48xf32>,
    return
  }
  func.func @transform_0(%arg0: i32, %arg1: i32) -> i32 {
    %c0_i32 = arith.constant 0 : i32
    %c0_i32_0 = arith.constant 0 : i32
    return %c0_i32 : i32
  }
  func.func @transform_1(%arg0: i32, %arg1: i32) -> i32 {
    %c0_i32 = arith.constant 0 : i32
    %c0_i32_0 = arith.constant 0 : i32
    return %c0_i32 : i32
  }
  func.func @transform_2(%arg0: i32, %arg1: i32) -> (i32, i32, i32) {
    %c0_i32 = arith.constant 0 : i32
    %c0_i32_0 = arith.constant 0 : i32
    return %arg0, %arg1, %c0_i32 : i32, i32, i32
  }
  func.func @transform_3(%arg0: i32, %arg1: i32) -> (i32, i32, i32) {
    %c0_i32 = arith.constant 0 : i32
    %c0_i32_0 = arith.constant 0 : i32
    return %arg0, %arg1, %c0_i32 : i32, i32, i32
  }
}

</mosaic_0001>

<bundles_post_ra>
// kernel: tpu_custom_call.1
= control target key start
LH: loop header
LB: loop body
LE: loop exit
PB: predicated region body
PF: predicated region fallthrough
CT: control target
= control target key end

     0   :  { %8 = vsyncpa [#allocation5], 0  ;;  %s849_s0 = inlined_call_operand.hbm [shape: f32[3], index: 0, kind: input, shape index: {}]   ;;  %s850_s1 = inlined_call_operand.vmem [shape: f32[3], index: 1, kind: input, shape index: {}]   ;;  %s851_s2 = inlined_call_operand.hbm [shape: u8[3,32,48], index: 2, kind: input, shape index: {}]   ;;  %s852_s3 = inlined_call_operand.hbm [shape: f32[3,32,48], index: 3, kind: output, shape index: {}]  }
   0x1   :  { %9 = vsyncpa [#allocation6], 0 }
   0x2   :  { %10 = vsyncpa [#allocation3], 0 }
   0x3   :  { %12 = vsyncpa [#allocation3 + $0x1], 0 }
   0x4   :  { %13 = vsyncpa [#allocation4], 0 }
   0x5   :  { %15 = vsyncpa [#allocation4 + $0x1], 0  ;;  %s658_s12 = smov 0   ;;  %s660_s13 = smov 0  }
   0x6   :  { %s662_s14 = smov 0   ;;  %s664_s15 = smov 0  }
   0x7   :  { %s666_s16 = smov 0   ;;  %s668_s17 = smov 0  }
   0x8 LB: > { %s384_s18 = sadd.s32 4294967295, %s630_s17   ;;  %s385_s19 = sadd.s32 4294967294, %s630_s17   ;;  %s630_s17 = sphi %s668_s17, %s21_s17   ;;  %s626_s16 = sphi %s666_s16, %s867_s16   ;;  %s622_s15 = sphi %s664_s15, %s866_s15   ;;  %s618_s14 = sphi %s662_s14, %s865_s14   ;;  %s614_s13 = sphi %s660_s13, %s864_s13   ;;  %s610_s12 = sphi %s658_s12, %s863_s12  }
   0x9   : > { %p97_p0 = scmp.ne.s32.totalorder %s614_s13, %s610_s12  ;;  %p692_p1 = scmp.eq.s32.totalorder %s384_s18, 0 }
   0xa   : > { %p696_p2 = scmp.eq.s32.totalorder %s384_s18, 2  ;;  %p129_p3 = scmp.eq.s32.totalorder %s385_s19, 2 }
   0xb   : > { %p702_p4 = por %p692_p1, %p97_p0  ;;  %p386_p5 = scmp.ge.s32.totalorder %s630_s17, 1 }
   0xc   : > { %p707_p6 = por %p129_p3, %p97_p0  ;;  %p136_p7 = scmp.lt.s32.totalorder %s630_s17, 4 }
   0xd   : > { %s158_s27 = sshll.u32 %s850_s1, 4  ;;  %s33_s29 = sadd.s32 1, %s626_s16  ;;  %s159_s27 = int_to_ptr.vmem [resolvable:$true] %s158_s27 }
   0xe   : > { %s856_s23 = scalar_select %p707_p6, 1, 0 }
   0xf   : > { %p712_p8 = pnand %p386_p5, %p136_p7  ;;  %p728_p11 = scmp.ge.s32.totalorder %s33_s29, 3 }
  0x10   : > { %s632_s4 = smov [#allocation2]   ;;  %s499_s7 = scalar_lea.vmem %s159_s27, 16 }
  0x11   : > { %p415_p9 = pneg %p712_p8  ;;  %p500_p12 = scmp.ne.s32.totalorder %s159_s27, %s499_s7 }
  0x12   : > { %p507_p5 = scmp.lt.s32.totalorder %s159_s27, %s159_s27  ;;  %p508_p7 = scmp.lt.s32.totalorder %s499_s7, %s499_s7 }
  0x13   : > { %p723_p10 = pnand %p415_p9, %p692_p1 }
  0x14   : > { %p509_p9 = por %p508_p7, %p507_p5 }
  0x15   : > { %418 = dma.hbm_to_smem (!%p723_p10), %s849_s0, 16, %s632_s4, [#allocation5]  }
  0x16   : > { %p501_p13 = pneg %p723_p10 }
  0x18   : > { %p502_p0 = pnand %p501_p13, %p500_p12 }
  0x1a   : > { %p503_p3 = pneg %p502_p0 }
  0x1c   : > { %p510_p6 = pnand %p509_p9, %p503_p3 }
  0x1e   : > { %513 = shalt.err (!%p510_p6)
}
  0x1f   : > { %s633_s8 = smov [#allocation7]   ;;  %s869_s29 = smov (%p728_p11, %s33_s29), 0 }
  0x20   : > { %421 = dma.vmem_to_smem (!%p723_p10), %s159_s27, 16, %s633_s8, [#allocation6]  }
  0x21   : > { %s84_s9 = sadd.s32 1, %s618_s14  ;;  %p91_p6 = scmp.ne.s32.totalorder %s618_s14, %s614_s13 }
  0x22   : > { %s79_s10 = ssub.s32 %s626_s16, %s869_s29  ;;  %p92_p12 = scmp.eq.s32.totalorder %s630_s17, 0 }
  0x23   : > { %p82_p13 = scmp.eq.s32.totalorder %s79_s10, 0  ;;  %p753_p0 = por %p696_p2, %p91_p6 }
  0x24   : > { %p93_p3 = por %p92_p12, %p91_p6  ;;  %p432_p5 = scmp.lt.s32.totalorder %s630_s17, 3 }
  0x25   : > { %s759_s18 = scalar_select %p82_p13, %s618_s14, %s84_s9  }
  0x26   : > { %s169_s19 = sand.u32 1, %s618_s14   ;;  %s391_s25 = sshll.u32 %s626_s16, 7 }
  0x27   : > { %s390_s26 = sshll.u32 %s169_s19, 3  ;;  %s179_s30 = scalar_lea.hbm %s851_s2, %s391_s25 }
  0x28   : > { %s173_s4 = scalar_lea.vmem [#allocation8], %s390_s26  ;;  %p766_p10 = pnand %p432_p5, %p93_p3 }
  0x29   : > { %s181_s5 = sshll.u32 %s173_s4, 4  ;;  %s170_s21 = scalar_lea.sflag [#allocation3], %s169_s19  ;;  %s182_s5 = int_to_ptr.vmem [resolvable:$true] %s181_s5 }
  0x2a   : > { %p516_p2 = pneg %p766_p10  ;;  %s527_s7 = scalar_lea.vmem %s182_s5, 128 }
  0x2b   : > { %p528_p11 = scmp.ne.s32.totalorder %s182_s5, %s527_s7  ;;  %s634_s8 = smov [#allocation8]  }
  0x2c   : > { %s532_s9 = sshll.u32 %s634_s8, 4  ;;  %s533_s9 = int_to_ptr.vmem [resolvable:$false] %s532_s9 }
  0x2d   : > { %p530_p7 = pnand %p528_p11, %p516_p2  ;;  %s534_s10 = scalar_lea.vmem %s533_s9, 256 }
  0x2e   : > { %p535_p6 = scmp.lt.s32.totalorder %s182_s5, %s533_s9  ;;  %p536_p12 = scmp.lt.s32.totalorder %s534_s10, %s527_s7 }
  0x2f   : > { %p531_p9 = pneg %p530_p7 }
  0x30   : > { %p537_p13 = por %p536_p12, %p535_p6 }
  0x32   : > { %p538_p3 = pnand %p537_p13, %p531_p9 }
  0x34   : > { %541 = shalt.err (!%p538_p3)
}
  0x35   : > { %425 = dma.hbm_to_vmem [thread:$0]  (!%p766_p10), %s179_s30, 128, %s182_s5, %s170_s21  }
  0x36   : > { %190 = sbr.rel (%p712_p8) target bundleno = 94 (0x5e), region = 32 }
  0x3b   : > { %593 = dma.done.wait (%p692_p1), [#allocation5], 16  }
  0x3c   : > { %595 = vsyncadd (%p692_p1), [#allocation5], 4294967280 }
  0x3d   : > { %597 = dma.done.wait (%p692_p1), [#allocation6], 16  }
  0x3e   : > { %599 = vsyncadd (%p692_p1), [#allocation6], 4294967280  ;;  %s785_s19 = sand.u32 1, %s614_s13  }
  0x3f   : > { %s395_s24 = sshll.u32 %s785_s19, 3  ;;  %s201_s25 = scalar_lea.sflag [#allocation3], %s785_s19 }
  0x40   : > { %s204_s26 = scalar_lea.vmem [#allocation8], %s395_s24 }
  0x41   : > { %601 = dma.done.wait (%p702_p4), %s201_s25, 128  }
  0x42   : > { %603 = vsyncadd (%p702_p4), %s201_s25, 4294967168 }
  0x43   : > { %209 = sfence }
  0x44   : > { %s396_s20 = sshll.u32 %s785_s19, 5  ;;  %s229_s27 = sld [smem:[#allocation2 + %s622_s15]]  ;;  %v231_v0 = vld [vmem:[%s204_s26] sm:$0xff]  ;;  %vm254_vm0 = vcmask 392192  }
  0x45   : > { %s230_s28 = sld [smem:[#allocation7 + %s622_s15]]  ;;  %v232_v1 = vunpack.c.0.s8 %v231_v0  ;;  %v233_v2 = vunpack.c.1.s8 %v231_v0  ;;  %v234_v3 = vunpack.c.2.s8 %v231_v0  ;;  %v235_v4 = vunpack.c.3.s8 %v231_v0  ;;  %s227_s22 = scalar_lea.vmem [#allocation9], %s396_s20 }
  0x46   : > { %s275_s30 = sshll.u32 %s227_s22, 4  ;;  %s402_s4 = sshll.u32 %s622_s15, 9  ;;  %s797_s30 = int_to_ptr.vmem [resolvable:$true] %s275_s30 }
  0x47   : > { %v236_v5 = vand.u32 255, %v232_v1  ;;  %v237_v6 = vand.u32 255, %v233_v2  ;;  %v238_v7 = vand.u32 255, %v234_v3  ;;  %v239_v8 = vand.u32 255, %v235_v4  ;;  %s802_s15 = scalar_lea.hbm %s852_s3, %s402_s4  ;;  %s260_s21 = scalar_lea.sflag [#allocation4], %s785_s19 }
  0x48   : > { %s542_s7 = scalar_lea.vmem %s797_s30, 512  ;;  %s635_s8 = smov [#allocation9]  }
  0x49   : > { %v240_v9 = vcvt.s32.f32 %v236_v5  ;;  %v241_v10 = vcvt.s32.f32 %v237_v6  ;;  %v242_v11 = vcvt.s32.f32 %v238_v7  ;;  %v243_v12 = vcvt.s32.f32 %v239_v8  ;;  %p543_p1 = scmp.ne.s32.totalorder %s797_s30, %s542_s7  ;;  %s546_s9 = sshll.u32 %s635_s8, 4  ;;  %s547_s9 = int_to_ptr.vmem [resolvable:$false] %s546_s9 }
  0x4a   : > { %v244_v13 = vstv %s229_s27  ;;  %s548_s10 = scalar_lea.vmem %s547_s9, 1024  ;;  %p549_p5 = scmp.lt.s32.totalorder %s797_s30, %s547_s9 }
  0x4b   : > { %v245_v14 = vmul.f32 %v244_v13, %v240_v9  ;;  %v249_v15 = vstv %s230_s28  ;;  %v246_v16 = vmul.f32 %v244_v13, %v241_v10  ;;  %v247_v17 = vmul.f32 %v244_v13, %v242_v11  ;;  %p544_p4 = pnand %p543_p1, %p753_p0  ;;  %p550_p10 = scmp.lt.s32.totalorder %s548_s10, %s542_s7 }
  0x4c   : > { %v248_v18 = vmul.f32 %v244_v13, %v243_v12 }
  0x4d   : > { %v250_v19 = vadd.f32 %v249_v15, %v245_v14  ;;  %v251_v20 = vadd.f32 %v249_v15, %v246_v16  ;;  %v252_v21 = vadd.f32 %v249_v15, %v247_v17  ;;  %p545_p8 = pneg %p544_p4  ;;  %p551_p2 = por %p550_p10, %p549_p5 }
  0x4e   : > { %v253_v22 = vadd.f32 %v249_v15, %v248_v18 }
  0x4f   : > { %255 = vst.msk [vmem:[%s227_s22] sm:$0xff] %vm254_vm0, %v250_v19  ;;  %256 = vst.msk [vmem:[%s227_s22 + $0x8] sm:$0xff] %vm254_vm0, %v251_v20  ;;  %p552_p11 = pnand %p551_p2, %p545_p8 }
  0x50   : > { %257 = vst.msk [vmem:[%s227_s22 + $0x10] sm:$0xff] %vm254_vm0, %v252_v21  ;;  %258 = vst.msk [vmem:[%s227_s22 + $0x18] sm:$0xff] %vm254_vm0, %v253_v22 }
  0x51   : > { %555 = shalt.err (!%p552_p11)
}
  0x52   : > { %s556_s24 = scalar_lea.hbm %s802_s15, 512  ;;  %s560_s20 = scalar_lea.hbm %s852_s3, 1536 }
  0x53   : > { %p557_p7 = scmp.ne.s32.totalorder %s802_s15, %s556_s24  ;;  %p561_p12 = scmp.lt.s32.totalorder %s802_s15, %s852_s3 }
  0x54   : > { %p562_p13 = scmp.lt.s32.totalorder %s560_s20, %s556_s24 }
  0x55   : > { %p558_p9 = pnand %p557_p7, %p753_p0 }
  0x56   : > { %p563_p3 = por %p562_p13, %p561_p12 }
  0x57   : > { %p559_p6 = pneg %p558_p9 }
  0x59   : > { %p564_p1 = pnand %p563_p3, %p559_p6 }
  0x5b   : > { %567 = shalt.err (!%p564_p1)
}
  0x5c   : > { %s636_s22 = smov 128   ;;  %s637_s4 = smov 8  }
  0x5d   : > { %413 = dma.vmem_to_hbm [thread:$0]  (%p753_p0), %s797_s30, 512, %s802_s15, %s260_s21, %s636_s22, %s636_s22, %s637_s4  }
  0x5e PF: > { %p435_p4 = scmp.ge.s32.totalorder %s630_s17, 2  ;;  %s290_s5 = sand.u32 1, %s610_s12  }
  0x5f   : > { %p862_p8 = scmp.ne.s32.totalorder %s856_s23, 0  ;;  %s291_s6 = scalar_lea.sflag [#allocation4], %s290_s5 }
  0x61   : > { %p427_p5 = pnand %p435_p4, %p862_p8 }
  0x63   : > { %p428_p10 = pneg %p427_p5 }
  0x65   : > { %605 = dma.done.wait (%p428_p10), %s291_s6, 512  }
  0x66   : > { %607 = vsyncadd (%p428_p10), %s291_s6, 4294966784  ;;  %s21_s17 = sadd.s32 1, %s630_s17   ;;  %s863_s12 = smov %s614_s13 }
  0x67   : > { %p18_p2 = scmp.ge.s32.totalorder %s21_s17, 5   ;;  %s864_s13 = smov %s618_s14 }
  0x68   : > { %s865_s14 = smov %s759_s18  ;;  %s866_s15 = smov %s626_s16 }
  0x69   : > { %s867_s16 = smov %s869_s29  ;;  %20 = sbr.rel (!%p18_p2) target bundleno = 8 (0x8), region = 87 }
  0x6e   :  { %296 = vsyncpa [#allocation3], 1 }
  0x6f   :  { %298 = vsyncpa [#allocation3 + $0x1], 1 }
  0x70   :  { %299 = vsyncpa [#allocation4], 1 }
  0x71   :  { %301 = vsyncpa [#allocation4 + $0x1], 1 }
  0x72   :  { %302 = vsyncpa [#allocation5], 1 }
  0x73   :  { %304 = vsyncpa [#allocation5 + $0x1], 1 }
  0x74   :  { %305 = vsyncpa [#allocation6], 1 }
  0x75   :  { %307 = vsyncpa [#allocation6 + $0x1], 1 }

</bundles_post_ra>
